<compile_context>
chip_gen: v7x
topology: tpu7x:2x2x1
jax: 0.10.0
libtpu: 0.0.40
codegen_flags: <defaults>
</compile_context>

<pallas_src>
import jax
import jax.numpy as jnp
import numpy as np
from jax.experimental import pallas as pl
from jax.experimental.pallas import tpu as pltpu


# ----------------------------------------------------------------------------
# Pallas kernel: two stacked GRU cells (seq_len = 1) + dense + ReLU
# ----------------------------------------------------------------------------
def gru_dense_kernel(x_ref, hcat_ref,
                     wi0_ref, wi1_ref, whd_ref,
                     bx0_ref, bhn0_ref, bx1_ref, bhn1_ref,
                     wd_ref, bd_ref,
                     out_ref):
    """One batch tile per grid step; all weights VMEM-resident (constant maps).

    Shapes/layout (gate columns ordered [r | z | n]):
      x_ref    : (block_b, in_features)  f32
      hcat_ref : (block_b, 2H)           f32   = [h0_layer0 | h0_layer1]
      wi*_ref  : (in, 3H)                bf16
      whd_ref  : (2H, 6H)                bf16  block-diag([Wh0, Wh1])
      bx*_ref  : (1, 3H)                 f32   = [bi_r+bh_r | bi_z+bh_z | bi_n]
      bhn*_ref : (1, H)                  f32   = bh_n (stays inside r * (...))
      wd_ref   : (H, out_features)       bf16
      bd_ref   : (1, out_features)       f32
      out_ref  : (block_b, 128)          f32   packed [relu_out | h1 | h2 | 0]
    """
    H = bhn0_ref.shape[1]
    B = x_ref.shape[0]
    H2, H3 = 2 * H, 3 * H

    def bdot(a, w):
        # bf16 x bf16 on the MXU, f32 accumulation; gate math stays f32.
        return jnp.dot(a.astype(jnp.bfloat16), w,
                       preferred_element_type=jnp.float32)

    hcat = hcat_ref[...]                                  # (B, 2H)
    # Both hidden-state matmuls fused into one block-diagonal MXU push.
    gh = bdot(hcat, whd_ref[...])                         # (B, 6H) = [gh0 | gh1]

    def cell(gx, gh_l, h_prev, bhn):
        # single sigmoid over the fused r|z slab
        rz = jax.nn.sigmoid(gx[:, :H2] + gh_l[:, :H2])    # (B, 2H)
        r = rz[:, :H]
        z = rz[:, H:H2]
        n = jnp.tanh(gx[:, H2:H3] + r * (gh_l[:, H2:H3] + bhn))
        return (1.0 - z) * n + z * h_prev

    x = x_ref[...]
    # layer 0
    gx0 = bdot(x, wi0_ref[...]) + bx0_ref[...]            # (B, 3H)
    h1 = cell(gx0, gh[:, :H3], hcat[:, :H], bhn0_ref[...])
    # layer 1 (input = layer-0 output; dropout skipped -> inference semantics)
    gx1 = bdot(h1, wi1_ref[...]) + bx1_ref[...]
    h2 = cell(gx1, gh[:, H3:], hcat[:, H:H2], bhn1_ref[...])

    # dense + relu
    out = jnp.maximum(bdot(h2, wd_ref[...]) + bd_ref[...], 0.0)

    # pack into one lane-dense slab -> single unmasked store
    pad_w = out_ref.shape[1] - (out.shape[1] + 2 * H)
    pieces = [out, h1, h2]
    if pad_w > 0:
        pieces.append(jnp.zeros((B, pad_w), jnp.float32))
    out_ref[...] = jnp.concatenate(pieces, axis=-1)


# ----------------------------------------------------------------------------
# Wrapper
# ----------------------------------------------------------------------------
def gru_forward(x, hidden, params, block_b=8):
    """x: (B, C, H, W) f32, hidden: (2, B, hidden_size) f32."""
    B = x.shape[0]
    x_flat = x.reshape(B, -1).astype(jnp.float32)       # == x.view(B, 1, -1)
    in_features = x_flat.shape[1]

    (wi0, wi1, whd, bx0, bhn0, bx1, bhn1, wd, bd) = params
    H = bhn0.shape[1]
    out_size = wd.shape[1]

    # lane-concat the two layer hidden states: row b = [h_layer0[b] | h_layer1[b]]
    hcat = jnp.transpose(hidden, (1, 0, 2)).reshape(B, 2 * H).astype(jnp.float32)

    padded_b = ((B + block_b - 1) // block_b) * block_b
    if padded_b != B:
        x_flat = jnp.pad(x_flat, ((0, padded_b - B), (0, 0)))
        hcat = jnp.pad(hcat, ((0, padded_b - B), (0, 0)))

    packed_w = out_size + 2 * H
    slab_w = max(128, pl.cdiv(packed_w, 128) * 128)      # lane-dense output

    batch_map = lambda b: (b, 0)                         # tiled over batch
    const_map = lambda b: (0, 0)                         # weights stay resident

    slab = pl.pallas_call(
        gru_dense_kernel,
        out_shape=jax.ShapeDtypeStruct((padded_b, slab_w), jnp.float32),
        grid=(padded_b // block_b,),
        in_specs=[
            pl.BlockSpec((block_b, in_features), batch_map),   # x
            pl.BlockSpec((block_b, 2 * H), batch_map),         # hcat
            pl.BlockSpec(wi0.shape, const_map),
            pl.BlockSpec(wi1.shape, const_map),
            pl.BlockSpec(whd.shape, const_map),
            pl.BlockSpec(bx0.shape, const_map),
            pl.BlockSpec(bhn0.shape, const_map),
            pl.BlockSpec(bx1.shape, const_map),
            pl.BlockSpec(bhn1.shape, const_map),
            pl.BlockSpec(wd.shape, const_map),
            pl.BlockSpec(bd.shape, const_map),
        ],
        out_specs=pl.BlockSpec((block_b, slab_w), batch_map),
        compiler_params=pltpu.CompilerParams(
            dimension_semantics=("parallel",)),           # shard batch over TCs (v7x)
    )(x_flat, hcat, wi0, wi1, whd, bx0, bhn0, bx1, bhn1, wd, bd)

    out = slab[:B, :out_size]
    h1 = slab[:B, out_size:out_size + H]
    h2 = slab[:B, out_size + H:out_size + 2 * H]
    return out, jnp.stack([h1, h2], axis=0)


# ----------------------------------------------------------------------------
# Parameter init (same distribution as PyTorch: U(-k, k), k = 1/sqrt(H)),
# emitted directly in the fused layouts, weights in bf16.
# NOTE: bf16 weights deviate slightly from PyTorch's fp32 nn.GRU numerics; the
# reference below uses the same bf16 weights so the check measures kernel
# correctness, not quantization drift.
# ----------------------------------------------------------------------------
def init_params(key, input_size, hidden_size, output_size):
    H = hidden_size
    k = 1.0 / np.sqrt(hidden_size)
    keys = jax.random.split(key, 10)

    def u(kk, shape):
        return jax.random.uniform(kk, shape, jnp.float32, -k, k)

    # layer 0 (input_size -> H), layer 1 (H -> H); gate columns ordered r,z,n
    wi0 = u(keys[0], (input_size, 3 * H)).astype(jnp.bfloat16)
    wh0 = u(keys[1], (H, 3 * H))
    bi0 = u(keys[2], (1, 3 * H))
    bh0 = u(keys[3], (1, 3 * H))
    wi1 = u(keys[4], (H, 3 * H)).astype(jnp.bfloat16)
    wh1 = u(keys[5], (H, 3 * H))
    bi1 = u(keys[6], (1, 3 * H))
    bh1 = u(keys[7], (1, 3 * H))
    # dense
    wd = u(keys[8], (H, output_size)).astype(jnp.bfloat16)
    bd = u(keys[9], (1, output_size))

    # block-diagonal fused hidden weight: (2H, 6H) = diag(Wh0, Wh1)
    whd = jnp.zeros((2 * H, 6 * H), jnp.float32)
    whd = whd.at[:H, :3 * H].set(wh0).at[H:, 3 * H:].set(wh1)
    whd = whd.astype(jnp.bfloat16)

    def fold(bi, bh):
        # pre-sum r/z biases; n-gate hidden bias must stay separate
        bx = jnp.concatenate([bi[:, :2 * H] + bh[:, :2 * H], bi[:, 2 * H:]],
                             axis=1)
        bhn = bh[:, 2 * H:]
        return bx, bhn

    bx0, bhn0 = fold(bi0, bh0)
    bx1, bhn1 = fold(bi1, bh1)
    return (wi0, wi1, whd, bx0, bhn0, bx1, bhn1, wd, bd)


# ----------------------------------------------------------------------------
# Pure-JAX reference (same bf16-weight numerics as the kernel)
# ----------------------------------------------------------------------------
def ref_forward(x, hidden, params):
    (wi0, wi1, whd, bx0, bhn0, bx1, bhn1, wd, bd) = params
    B = x.shape[0]
    H = bhn0.shape[1]
    xf = x.reshape(B, -1).astype(jnp.float32)
    wh0 = whd[:H, :3 * H]
    wh1 = whd[H:, 3 * H:]

    def bdot(a, w):
        return jnp.dot(a.astype(jnp.bfloat16), w,
                       preferred_element_type=jnp.float32)

    def cell(xx, h, wi, wh, bx, bhn):
        gx = bdot(xx, wi) + bx
        gh = bdot(h, wh)
        r = jax.nn.sigmoid(gx[:, :H] + gh[:, :H])
        z = jax.nn.sigmoid(gx[:, H:2 * H] + gh[:, H:2 * H])
        n = jnp.tanh(gx[:, 2 * H:] + r * (gh[:, 2 * H:] + bhn))
        return (1.0 - z) * n + z * h

    h1 = cell(xf, hidden[0], wi0, wh0, bx0, bhn0)
    h2 = cell(h1, hidden[1], wi1, wh1, bx1, bhn1)
    out = jnp.maximum(bdot(h2, wd) + bd, 0.0)
    return out, jnp.stack([h1, h2], axis=0)


# ----------------------------------------------------------------------------
if __name__ == "__main__":
    B, C, Hsp, Wsp = 2, 4, 16, 16             # input image (NCHW)
    input_size = C * Hsp * Wsp                # 1024, matches x.view(B, 1, -1)
    hidden_size = 32
    output_size = 16

    key = jax.random.PRNGKey(0)
    k_x, k_p = jax.random.split(key)

    x = jax.random.normal(k_x, (B, C, Hsp, Wsp), dtype=jnp.float32)
    hidden0 = jnp.zeros((2, B, hidden_size), dtype=jnp.float32)  # init_hidden
    params = init_params(k_p, input_size, hidden_size, output_size)

    out, h_n = gru_forward(x, hidden0, params)
    out = jax.block_until_ready(out)
    h_n = jax.block_until_ready(h_n)

    # sanity check vs pure-JAX reference (same bf16-weight numerics)
    out_ref, hn_ref = ref_forward(x, hidden0, params)
    np.testing.assert_allclose(np.asarray(out), np.asarray(out_ref),
                               rtol=1e-4, atol=1e-4)
    np.testing.assert_allclose(np.asarray(h_n), np.asarray(hn_ref),
                               rtol=1e-4, atol=1e-4)

    assert out.shape == (B, output_size)
    assert h_n.shape == (2, B, hidden_size)
    print("KERNEL_OK")
</pallas_src>

<mosaic_0001>
module attributes {stable_mosaic.version = 11 : i64} {
  func.func @gru_dense_kernel(%arg0: i32, %arg1: memref<8x1024xf32, #tpu.memory_space<vmem>>, %arg2: memref<8x64xf32, #tpu.memory_space<vmem>>, %arg3: memref<1024x96xbf16, #tpu.memory_space<vmem>>, %arg4: memref<32x96xbf16, #tpu.memory_space<vmem>>, %arg5: memref<64x192xbf16, #tpu.memory_space<vmem>>, %arg6: memref<1x96xf32, #tpu.memory_space<vmem>>, %arg7: memref<1x32xf32, #tpu.memory_space<vmem>>, %arg8: memref<1x96xf32, #tpu.memory_space<vmem>>, %arg9: memref<1x32xf32, #tpu.memory_space<vmem>>, %arg10: memref<32x16xbf16, #tpu.memory_space<vmem>>, %arg11: memref<1x16xf32, #tpu.memory_space<vmem>>, %arg12: memref<8x128xf32, #tpu.memory_space<vmem>>) attributes {dimension_semantics = [#tpu.dimension_semantics<parallel>], iteration_bounds = array<i64: 1>, scalar_prefetch = 0 : i64, scratch_operands = 0 : i64, tpu.core_type = #tpu.core_type<tc>, window_params = [{transform_indices = @transform_0, window_bounds = array<i64: 8, 1024>}, {transform_indices = @transform_1, window_bounds = array<i64: 8, 64>}, {pipeline_mode = #tpu.pipeline_mode<synchronous>, transform_indices = @transform_2, window_bounds = array<i64: 1024, 96>}, {pipeline_mode = #tpu.pipeline_mode<synchronous>, transform_indices = @transform_3, window_bounds = array<i64: 32, 96>}, {pipeline_mode = #tpu.pipeline_mode<synchronous>, transform_indices = @transform_4, window_bounds = array<i64: 64, 192>}, {pipeline_mode = #tpu.pipeline_mode<synchronous>, transform_indices = @transform_5, window_bounds = array<i64: 1, 96>}, {pipeline_mode = #tpu.pipeline_mode<synchronous>, transform_indices = @transform_6, window_bounds = array<i64: 1, 32>}, {pipeline_mode = #tpu.pipeline_mode<synchronous>, transform_indices = @transform_7, window_bounds = array<i64: 1, 96>}, {pipeline_mode = #tpu.pipeline_mode<synchronous>, transform_indices = @transform_8, window_bounds = array<i64: 1, 32>}, {pipeline_mode = #tpu.pipeline_mode<synchronous>, transform_indices = @transform_9, window_bounds = array<i64: 32, 16>}, {pipeline_mode = #tpu.pipeline_mode<synchronous>, transform_indices = @transform_10, window_bounds = array<i64: 1, 16>}, {transform_indices = @transform_11, window_bounds = array<i64: 8, 128>}]} {
    %c0 = arith.constant 0 : index
    %c0_0 = arith.constant 0 : index
    %0 = vector.load %arg2[%c0, %c0_0] : memref<8x64xf32, #tpu.memory_space<vmem>>, vector<8x64xf32>
    %c0_1 = arith.constant 0 : index
    %c0_2 = arith.constant 0 : index
    %1 = vector.load %arg5[%c0_1, %c0_2] : memref<64x192xbf16, #tpu.memory_space<vmem>>, vector<64x192xbf16>
    %2 = arith.truncf %0 : vector<8x64xf32> to vector<8x64xbf16>
    %cst = arith.constant dense<0.000000e+00> : vector<8x192xf32>
    %3 = tpu.matmul %2, %1, %cst {dimension_numbers = #tpu.dot_dimension_numbers<[1], [0], [0], [1], [0, 0, 1, 1], [], []>} : vector<8x64xbf16>, vector<64x192xbf16>, vector<8x192xf32> -> vector<8x192xf32>
    %c0_3 = arith.constant 0 : index
    %c0_4 = arith.constant 0 : index
    %4 = vector.load %arg1[%c0_3, %c0_4] : memref<8x1024xf32, #tpu.memory_space<vmem>>, vector<8x1024xf32>
    %c0_5 = arith.constant 0 : index
    %c0_6 = arith.constant 0 : index
    %5 = vector.load %arg3[%c0_5, %c0_6] : memref<1024x96xbf16, #tpu.memory_space<vmem>>, vector<1024x96xbf16>
    %6 = arith.truncf %4 : vector<8x1024xf32> to vector<8x1024xbf16>
    %cst_7 = arith.constant dense<0.000000e+00> : vector<8x96xf32>
    %7 = tpu.matmul %6, %5, %cst_7 {dimension_numbers = #tpu.dot_dimension_numbers<[1], [0], [0], [1], [0, 0, 1, 1], [], []>} : vector<8x1024xbf16>, vector<1024x96xbf16>, vector<8x96xf32> -> vector<8x96xf32>
    %c0_8 = arith.constant 0 : index
    %c0_9 = arith.constant 0 : index
    %8 = vector.load %arg6[%c0_8, %c0_9] : memref<1x96xf32, #tpu.memory_space<vmem>>, vector<1x96xf32>
    %9 = vector.broadcast %8 : vector<1x96xf32> to vector<8x96xf32>
    %10 = arith.addf %7, %9 : vector<8x96xf32>
    %11 = vector.extract_strided_slice %3 {offsets = [0, 0], sizes = [8, 96], strides = [1, 1]} : vector<8x192xf32> to vector<8x96xf32>
    %12 = vector.extract_strided_slice %0 {offsets = [0, 0], sizes = [8, 32], strides = [1, 1]} : vector<8x64xf32> to vector<8x32xf32>
    %c0_10 = arith.constant 0 : index
    %c0_11 = arith.constant 0 : index
    %13 = vector.load %arg7[%c0_10, %c0_11] : memref<1x32xf32, #tpu.memory_space<vmem>>, vector<1x32xf32>
    %14 = vector.extract_strided_slice %10 {offsets = [0, 0], sizes = [8, 64], strides = [1, 1]} : vector<8x96xf32> to vector<8x64xf32>
    %15 = vector.extract_strided_slice %11 {offsets = [0, 0], sizes = [8, 64], strides = [1, 1]} : vector<8x96xf32> to vector<8x64xf32>
    %16 = arith.addf %14, %15 : vector<8x64xf32>
    %17 = arith.negf %16 : vector<8x64xf32>
    %18 = math.exp %17 : vector<8x64xf32>
    %cst_12 = arith.constant 1.000000e+00 : f32
    %19 = vector.broadcast %cst_12 : f32 to vector<8x64xf32>
    %20 = arith.addf %19, %18 : vector<8x64xf32>
    %21 = arith.divf %19, %20 : vector<8x64xf32>
    %22 = vector.extract_strided_slice %21 {offsets = [0, 0], sizes = [8, 32], strides = [1, 1]} : vector<8x64xf32> to vector<8x32xf32>
    %23 = vector.extract_strided_slice %21 {offsets = [0, 32], sizes = [8, 32], strides = [1, 1]} : vector<8x64xf32> to vector<8x32xf32>
    %24 = vector.extract_strided_slice %10 {offsets = [0, 64], sizes = [8, 32], strides = [1, 1]} : vector<8x96xf32> to vector<8x32xf32>
    %25 = vector.extract_strided_slice %11 {offsets = [0, 64], sizes = [8, 32], strides = [1, 1]} : vector<8x96xf32> to vector<8x32xf32>
    %26 = vector.broadcast %13 : vector<1x32xf32> to vector<8x32xf32>
    %27 = arith.addf %25, %26 : vector<8x32xf32>
    %28 = arith.mulf %22, %27 : vector<8x32xf32>
    %29 = arith.addf %24, %28 : vector<8x32xf32>
    %30 = math.tanh %29 : vector<8x32xf32>
    %cst_13 = arith.constant 1.000000e+00 : f32
    %31 = vector.broadcast %cst_13 : f32 to vector<8x32xf32>
    %32 = arith.subf %31, %23 : vector<8x32xf32>
    %33 = arith.mulf %32, %30 : vector<8x32xf32>
    %34 = arith.mulf %23, %12 : vector<8x32xf32>
    %35 = arith.addf %33, %34 : vector<8x32xf32>
    %c0_14 = arith.constant 0 : index
    %c0_15 = arith.constant 0 : index
    %36 = vector.load %arg4[%c0_14, %c0_15] : memref<32x96xbf16, #tpu.memory_space<vmem>>, vector<32x96xbf16>
    %37 = arith.truncf %35 : vector<8x32xf32> to vector<8x32xbf16>
    %cst_16 = arith.constant dense<0.000000e+00> : vector<8x96xf32>
    %38 = tpu.matmul %37, %36, %cst_16 {dimension_numbers = #tpu.dot_dimension_numbers<[1], [0], [0], [1], [0, 0, 1, 1], [], []>} : vector<8x32xbf16>, vector<32x96xbf16>, vector<8x96xf32> -> vector<8x96xf32>
    %c0_17 = arith.constant 0 : index
    %c0_18 = arith.constant 0 : index
    %39 = vector.load %arg8[%c0_17, %c0_18] : memref<1x96xf32, #tpu.memory_space<vmem>>, vector<1x96xf32>
    %40 = vector.broadcast %39 : vector<1x96xf32> to vector<8x96xf32>
    %41 = arith.addf %38, %40 : vector<8x96xf32>
    %42 = vector.extract_strided_slice %3 {offsets = [0, 96], sizes = [8, 96], strides = [1, 1]} : vector<8x192xf32> to vector<8x96xf32>
    %43 = vector.extract_strided_slice %0 {offsets = [0, 32], sizes = [8, 32], strides = [1, 1]} : vector<8x64xf32> to vector<8x32xf32>
    %c0_19 = arith.constant 0 : index
    %c0_20 = arith.constant 0 : index
    %44 = vector.load %arg9[%c0_19, %c0_20] : memref<1x32xf32, #tpu.memory_space<vmem>>, vector<1x32xf32>
    %45 = vector.extract_strided_slice %41 {offsets = [0, 0], sizes = [8, 64], strides = [1, 1]} : vector<8x96xf32> to vector<8x64xf32>
    %46 = vector.extract_strided_slice %42 {offsets = [0, 0], sizes = [8, 64], strides = [1, 1]} : vector<8x96xf32> to vector<8x64xf32>
    %47 = arith.addf %45, %46 : vector<8x64xf32>
    %48 = arith.negf %47 : vector<8x64xf32>
    %49 = math.exp %48 : vector<8x64xf32>
    %cst_21 = arith.constant 1.000000e+00 : f32
    %50 = vector.broadcast %cst_21 : f32 to vector<8x64xf32>
    %51 = arith.addf %50, %49 : vector<8x64xf32>
    %52 = arith.divf %50, %51 : vector<8x64xf32>
    %53 = vector.extract_strided_slice %52 {offsets = [0, 0], sizes = [8, 32], strides = [1, 1]} : vector<8x64xf32> to vector<8x32xf32>
    %54 = vector.extract_strided_slice %52 {offsets = [0, 32], sizes = [8, 32], strides = [1, 1]} : vector<8x64xf32> to vector<8x32xf32>
    %55 = vector.extract_strided_slice %41 {offsets = [0, 64], sizes = [8, 32], strides = [1, 1]} : vector<8x96xf32> to vector<8x32xf32>
    %56 = vector.extract_strided_slice %42 {offsets = [0, 64], sizes = [8, 32], strides = [1, 1]} : vector<8x96xf32> to vector<8x32xf32>
    %57 = vector.broadcast %44 : vector<1x32xf32> to vector<8x32xf32>
    %58 = arith.addf %56, %57 : vector<8x32xf32>
    %59 = arith.mulf %53, %58 : vector<8x32xf32>
    %60 = arith.addf %55, %59 : vector<8x32xf32>
    %61 = math.tanh %60 : vector<8x32xf32>
    %cst_22 = arith.constant 1.000000e+00 : f32
    %62 = vector.broadcast %cst_22 : f32 to vector<8x32xf32>
    %63 = arith.subf %62, %54 : vector<8x32xf32>
    %64 = arith.mulf %63, %61 : vector<8x32xf32>
    %65 = arith.mulf %54, %43 : vector<8x32xf32>
    %66 = arith.addf %64, %65 : vector<8x32xf32>
    %c0_23 = arith.constant 0 : index
    %c0_24 = arith.constant 0 : index
    %67 = vector.load %arg10[%c0_23, %c0_24] : memref<32x16xbf16, #tpu.memory_space<vmem>>, vector<32x16xbf16>
    %68 = arith.truncf %66 : vector<8x32xf32> to vector<8x32xbf16>
    %cst_25 = arith.constant dense<0.000000e+00> : vector<8x16xf32>
    %69 = tpu.matmul %68, %67, %cst_25 {dimension_numbers = #tpu.dot_dimension_numbers<[1], [0], [0], [1], [0, 0, 1, 1], [], []>} : vector<8x32xbf16>, vector<32x16xbf16>, vector<8x16xf32> -> vector<8x16xf32>
    %c0_26 = arith.constant 0 : index
    %c0_27 = arith.constant 0 : index
    %70 = vector.load %arg11[%c0_26, %c0_27] : memref<1x16xf32, #tpu.memory_space<vmem>>, vector<1x16xf32>
    %71 = vector.broadcast %70 : vector<1x16xf32> to vector<8x16xf32>
    %72 = arith.addf %69, %71 : vector<8x16xf32>
    %cst_28 = arith.constant 0.000000e+00 : f32
    %73 = vector.broadcast %cst_28 : f32 to vector<8x16xf32>
    %74 = arith.maximumf %72, %73 : vector<8x16xf32>
    %cst_29 = arith.constant 0.000000e+00 : f32
    %75 = vector.broadcast %cst_29 : f32 to vector<8x48xf32>
    %76 = tpu.concatenate %74, %35, %66, %75 in 1 : vector<8x16xf32>, vector<8x32xf32>, vector<8x32xf32>, vector<8x48xf32> -> vector<8x128xf32>
    %c0_30 = arith.constant 0 : index
    %c0_31 = arith.constant 0 : index
    %77 = vector.load %arg12[%c0_30, %c0_31] : memref<8x128xf32, #tpu.memory_space<vmem>>, vector<8x128xf32>
    tpu.vector_store %arg12[%c0_30, %c0_31], %76 {strides = array<i32>} : memref<8x128xf32, #tpu.memory_space<vmem>>, vector<8x128xf32>,
    return
  }
  func.func @transform_0(%arg0: i32) -> (i32, i32) {
    %c0_i32 = arith.constant 0 : i32
    %c0_i32_0 = arith.constant 0 : i32
    return %arg0, %c0_i32 : i32, i32
  }
  func.func @transform_1(%arg0: i32) -> (i32, i32) {
    %c0_i32 = arith.constant 0 : i32
    %c0_i32_0 = arith.constant 0 : i32
    return %arg0, %c0_i32 : i32, i32
  }
  func.func @transform_2(%arg0: i32) -> (i32, i32) {
    %c0_i32 = arith.constant 0 : i32
    %c0_i32_0 = arith.constant 0 : i32
    %c0_i32_1 = arith.constant 0 : i32
    return %c0_i32, %c0_i32_0 : i32, i32
  }
  func.func @transform_3(%arg0: i32) -> (i32, i32) {
    %c0_i32 = arith.constant 0 : i32
    %c0_i32_0 = arith.constant 0 : i32
    %c0_i32_1 = arith.constant 0 : i32
    return %c0_i32, %c0_i32_0 : i32, i32
  }
  func.func @transform_4(%arg0: i32) -> (i32, i32) {
    %c0_i32 = arith.constant 0 : i32
    %c0_i32_0 = arith.constant 0 : i32
    %c0_i32_1 = arith.constant 0 : i32
    return %c0_i32, %c0_i32_0 : i32, i32
  }
  func.func @transform_5(%arg0: i32) -> (i32, i32) {
    %c0_i32 = arith.constant 0 : i32
    %c0_i32_0 = arith.constant 0 : i32
    %c0_i32_1 = arith.constant 0 : i32
    return %c0_i32, %c0_i32_0 : i32, i32
  }
  func.func @transform_6(%arg0: i32) -> (i32, i32) {
    %c0_i32 = arith.constant 0 : i32
    %c0_i32_0 = arith.constant 0 : i32
    %c0_i32_1 = arith.constant 0 : i32
    return %c0_i32, %c0_i32_0 : i32, i32
  }
  func.func @transform_7(%arg0: i32) -> (i32, i32) {
    %c0_i32 = arith.constant 0 : i32
    %c0_i32_0 = arith.constant 0 : i32
    %c0_i32_1 = arith.constant 0 : i32
    return %c0_i32, %c0_i32_0 : i32, i32
  }
  func.func @transform_8(%arg0: i32) -> (i32, i32) {
    %c0_i32 = arith.constant 0 : i32
    %c0_i32_0 = arith.constant 0 : i32
    %c0_i32_1 = arith.constant 0 : i32
    return %c0_i32, %c0_i32_0 : i32, i32
  }
  func.func @transform_9(%arg0: i32) -> (i32, i32) {
    %c0_i32 = arith.constant 0 : i32
    %c0_i32_0 = arith.constant 0 : i32
    %c0_i32_1 = arith.constant 0 : i32
    return %c0_i32, %c0_i32_0 : i32, i32
  }
  func.func @transform_10(%arg0: i32) -> (i32, i32) {
    %c0_i32 = arith.constant 0 : i32
    %c0_i32_0 = arith.constant 0 : i32
    %c0_i32_1 = arith.constant 0 : i32
    return %c0_i32, %c0_i32_0 : i32, i32
  }
  func.func @transform_11(%arg0: i32) -> (i32, i32) {
    %c0_i32 = arith.constant 0 : i32
    %c0_i32_0 = arith.constant 0 : i32
    return %arg0, %c0_i32 : i32, i32
  }
}

</mosaic_0001>

<bundles_post_ra>
// kernel: tpu_custom_call.1
= control target key start
LH: loop header
LB: loop body
LE: loop exit
PB: predicated region body
PF: predicated region fallthrough
CT: control target
= control target key end

     0   :  { %v1406_v2 = vmov 0   ;;  %vm90_vm0 = vcmask 523264   ;;  %s1790_s0 = inlined_call_operand.vmem [shape: f32[8,1024], index: 0, kind: input, shape index: {}]   ;;  %s1791_s1 = inlined_call_operand.vmem [shape: f32[8,64], index: 1, kind: input, shape index: {}]   ;;  %s1792_s2 = inlined_call_operand.vmem [shape: bf16[1024,96], index: 2, kind: input, shape index: {}]   ;;  %s1793_s3 = inlined_call_operand.vmem [shape: bf16[32,96], index: 3, kind: input, shape index: {}]   ;;  %s1794_s4 = inlined_call_operand.vmem [shape: bf16[64,192], index: 4, kind: input, shape index: {}]   ;;  %s1795_s5 = inlined_call_operand.vmem [shape: f32[1,96], index: 5, kind: input, shape index: {}]   ;;  %s1796_s6 = inlined_call_operand.vmem [shape: f32[1,32], index: 6, kind: input, shape index: {}]   ;;  %s1797_s7 = inlined_call_operand.vmem [shape: f32[1,96], index: 7, kind: input, shape index: {}]   ;;  %s1798_s8 = inlined_call_operand.vmem [shape: f32[1,32], index: 8, kind: input, shape index: {}]   ;;  %s1799_s9 = inlined_call_operand.vmem [shape: bf16[32,16], index: 9, kind: input, shape index: {}]   ;;  %s1800_s10 = inlined_call_operand.vmem [shape: f32[1,16], index: 10, kind: input, shape index: {}]   ;;  %s1801_s11 = inlined_call_operand.hbm [shape: f32[8,128], index: 11, kind: output, shape index: {}]  }
   0x1   :  { %v1290_v0 = vld [vmem:[%s1794_s4 + $0x4] ss:$8 sps:$4 sm:$0xff]   ;;  %v1292_v1 = vld [vmem:[%s1794_s4] ss:$8 sps:$4 sm:$0xff]   ;;  %126 = vmatprep.mubr.bf16.mxu0 %v1406_v2  ;;  %v1293_v3 = vld [vmem:[%s1794_s4 + $0x14] ss:$8 sps:$4 sm:$0xff]  }
   0x2   :  { %94 = vmatprep.subr.bf16.mxu0 %v1290_v0  ;;  %v1295_v4 = vld [vmem:[%s1794_s4 + $0x10] ss:$8 sps:$4 sm:$0xff]   ;;  %v1296_v5 = vld [vmem:[%s1792_s2 + $0x40] sm:$0xff]   ;;  %v1301_v9 = vld [vmem:[%s1792_s2 + $0x48] sm:$0xff]  }
   0x3   :  { %95 = vmatpush1.bf16.msra.mxu0 %v1292_v1  ;;  %v1297_v6 = vld [vmem:[%s1792_s2] sm:$0xff]   ;;  %1171 = vmatprep.subr.bf16.mxu1 %v1296_v5  ;;  %v1302_v10 = vld [vmem:[%s1792_s2 + $0x8] sm:$0xff]   ;;  %v1303_v11 = vld [vmem:[%s1794_s4 + $0x34] ss:$8 sps:$4 sm:$0xff]  }
   0x4   :  { %96 = vmatprep.subr.bf16.mxu0 %v1293_v3  ;;  %v1298_v7 = vld [vmem:[%s1794_s4 + $0x24] ss:$8 sps:$4 sm:$0xff]   ;;  %v1300_v8 = vld [vmem:[%s1794_s4 + $0x20] ss:$8 sps:$4 sm:$0xff]   ;;  %1172 = vmatpush3.bf16.msra.mxu1 %v1297_v6  ;;  %v1305_v12 = vld [vmem:[%s1794_s4 + $0x30] ss:$8 sps:$4 sm:$0xff]  }
   0x5   :  { %1173 = vmatprep.subr.bf16.mxu1 %v1301_v9  ;;  %v1306_v13 = vld [vmem:[%s1792_s2 + $0x50] sm:$0xff]   ;;  %v1520_v15 = vld [vmem:[%s1791_s1] sm:$0xff]  ;;  %v1310_v19 = vld [vmem:[%s1792_s2 + $0x58] sm:$0xff]   ;;  %s1407_s1 = smov 64  }
   0x6   :  { %v1307_v14 = vld [vmem:[%s1792_s2 + $0x10] sm:$0xff]   ;;  %v1308_v16 = vld [vmem:[%s1792_s2 + $0xc0] sm:$0xff]   ;;  %v49_v18 = vpack.c.bf16 %v1520_v15, %v1520_v15  ;;  %v1311_v20 = vld [vmem:[%s1792_s2 + $0x18] sm:$0xff]  }
   0x7   :  { %97 = vmatpush1.bf16.msra.mxu0 %v1295_v4  ;;  %v1309_v17 = vld [vmem:[%s1792_s2 + $0x80] sm:$0xff]   ;;  %v1312_v21 = vld [vmem:[%s1792_s2 + $0xc8] sm:$0xff]   ;;  %v1316_v25 = vld [vmem:[%s1792_s2 + $0xd0] sm:$0xff]  }
   0x8   :  { %98 = vmatprep.subr.bf16.mxu0 %v1298_v7  ;;  %1174 = vmatpush3.bf16.msra.mxu1 %v1302_v10  ;;  %v1313_v22 = vld [vmem:[%s1792_s2 + $0x88] sm:$0xff]   ;;  %v1314_v23 = vld [vmem:[%s1792_s2 + $0x60] sm:$0xff]   ;;  %v1317_v26 = vld [vmem:[%s1792_s2 + $0x90] sm:$0xff]  }
   0x9   :  { %1175 = vmatprep.subr.bf16.mxu1 %v1306_v13  ;;  %v1315_v24 = vld [vmem:[%s1792_s2 + $0x20] sm:$0xff]   ;;  %v1318_v27 = vld [vmem:[%s1792_s2 + $0x68] sm:$0xff]   ;;  %v1320_v29 = vld [vmem:[%s1792_s2 + $0xd8] sm:$0xff]  }
   0xa   :  { %v1319_v28 = vld [vmem:[%s1792_s2 + $0x28] sm:$0xff]   ;;  %v1321_v30 = vld [vmem:[%s1792_s2 + $0x98] sm:$0xff]   ;;  %v1322_v31 = vld [vmem:[%s1792_s2 + $0x70] sm:$0xff]  }
   0xb   :  { %99 = vmatpush1.bf16.msra.mxu0 %v1300_v8  ;;  %v1323_v32 = vld [vmem:[%s1792_s2 + $0x30] sm:$0xff]   ;;  %v1324_v33 = vld [vmem:[%s1792_s2 + $0xe0] sm:$0xff]   ;;  %v1326_v35 = vld [vmem:[%s1792_s2 + $0x78] sm:$0xff]  }
   0xc   :  { %100 = vmatprep.subr.bf16.mxu0 %v1303_v11  ;;  %1176 = vmatpush3.bf16.msra.mxu1 %v1307_v14  ;;  %v1325_v34 = vld [vmem:[%s1792_s2 + $0xa0] sm:$0xff]   ;;  %v1327_v36 = vld [vmem:[%s1792_s2 + $0x38] sm:$0xff]   ;;  %v1328_v37 = vld [vmem:[%s1792_s2 + $0xe8] sm:$0xff]  }
   0xd   :  { %1177 = vmatprep.subr.bf16.mxu1 %v1310_v19  ;;  %v1329_v38 = vld [vmem:[%s1792_s2 + $0xa8] sm:$0xff]   ;;  %v1330_v41 = vld [vmem:[%s1792_s2 + $0x140] sm:$0xff]   ;;  %v1332_v45 = vld [vmem:[%s1792_s2 + $0xf0] sm:$0xff]  }
   0xe   :  { %v136_v39 = vld [vmem:[%s1790_s0 + $0x8] sm:$0xff]  ;;  %v135_v42 = vld [vmem:[%s1790_s0] sm:$0xff]  ;;  %v1333_v46 = vld [vmem:[%s1792_s2 + $0xb0] sm:$0xff]  }
   0xf   :  { %101 = vmatpush1.bf16.msra.mxu0 %v1305_v12  ;;  %v272_v40 = vpack.c.bf16 %v136_v39, %v136_v39  ;;  %v271_v43 = vpack.c.bf16 %v135_v42, %v135_v42  ;;  %v1331_v44 = vld [vmem:[%s1792_s2 + $0x100] sm:$0xff]   ;;  %v1334_v47 = vld [vmem:[%s1792_s2 + $0x148] sm:$0xff]   ;;  %v1336_v49 = vld [vmem:[%s1792_s2 + $0xf8] sm:$0xff]  }
  0x10   :  { %1193 = vmatprep.subr.bf16.mxu0 %v1308_v16  ;;  %1178 = vmatpush3.bf16.msra.mxu1 %v1311_v20  ;;  %v1335_v48 = vld [vmem:[%s1792_s2 + $0x108] sm:$0xff]   ;;  %v1337_v50 = vld [vmem:[%s1792_s2 + $0xb8] sm:$0xff]   ;;  %v1338_v51 = vld [vmem:[%s1792_s2 + $0x150] sm:$0xff]  }
  0x11   :  { %1179 = vmatprep.subr.bf16.mxu1 %v1314_v23  ;;  %702 = vmatprep.mubr.bf16.mxu1 %v272_v40  ;;  %v1339_v52 = vld [vmem:[%s1792_s2 + $0x110] sm:$0xff]   ;;  %v138_v53 = vld [vmem:[%s1790_s0 + $0x18] sm:$0xff]  ;;  %v1340_v55 = vld [vmem:[%s1792_s2 + $0x1c0] sm:$0xff]  }
  0x12   :  { %1093 = vmatmul.mubr.msk.bf16.vlgmr.msra.gmra.mrb[0].mxu0 %vm90_vm0, %v49_v18  ;;  %v274_v54 = vpack.c.bf16 %v138_v53, %v138_v53  ;;  %v137_v56 = vld [vmem:[%s1790_s0 + $0x10] sm:$0xff]  ;;  %v1341_v58 = vld [vmem:[%s1792_s2 + $0x180] sm:$0xff]   ;;  %v1342_v59 = vld [vmem:[%s1792_s2 + $0x158] sm:$0xff]  }
  0x13   :  { %1194 = vmatpush3.bf16.msra.mxu0 %v1309_v17  ;;  %v273_v57 = vpack.c.bf16 %v137_v56, %v137_v56  ;;  %v1343_v60 = vld [vmem:[%s1792_s2 + $0x118] sm:$0xff]   ;;  %v1344_v61 = vld [vmem:[%s1792_s2 + $0x1c8] sm:$0xff]   ;;  %v1346_v63 = vld [vmem:[%s1792_s2 + $0x160] sm:$0xff]  }
  0x14   :  { %1195 = vmatprep.subr.bf16.mxu0 %v1312_v21  ;;  %1180 = vmatpush3.bf16.msra.mxu1 %v1315_v24  ;;  %v1345_v62 = vld [vmem:[%s1792_s2 + $0x188] sm:$0xff]   ;;  %v1347_v0 = vld [vmem:[%s1792_s2 + $0x120] sm:$0xff]   ;;  %v1348_v1 = vld [vmem:[%s1792_s2 + $0x1d0] sm:$0xff]  }
  0x15   :  { %1181 = vmatprep.subr.bf16.mxu1 %v1318_v27  ;;  %742 = vmatprep.mubr.bf16.mxu0 %v274_v54  ;;  %v1349_v2 = vld [vmem:[%s1792_s2 + $0x190] sm:$0xff]   ;;  %v1350_v3 = vld [vmem:[%s1792_s2 + $0x168] sm:$0xff]   ;;  %v1352_v5 = vld [vmem:[%s1792_s2 + $0x1d8] sm:$0xff]  }
  0x16   :  { %v1351_v4 = vld [vmem:[%s1792_s2 + $0x128] sm:$0xff]   ;;  %v1353_v6 = vld [vmem:[%s1792_s2 + $0x198] sm:$0xff]   ;;  %v1354_v7 = vld [vmem:[%s1792_s2 + $0x170] sm:$0xff]  }
  0x17   :  { %1196 = vmatpush3.bf16.msra.mxu0 %v1313_v22  ;;  %v1355_v8 = vld [vmem:[%s1792_s2 + $0x130] sm:$0xff]   ;;  %v1356_v9 = vld [vmem:[%s1792_s2 + $0x1e0] sm:$0xff]   ;;  %v1358_v11 = vld [vmem:[%s1792_s2 + $0x178] sm:$0xff]  }
  0x18   :  { %1197 = vmatprep.subr.bf16.mxu0 %v1316_v25  ;;  %1182 = vmatpush3.bf16.msra.mxu1 %v1319_v28  ;;  %v1357_v10 = vld [vmem:[%s1792_s2 + $0x1a0] sm:$0xff]   ;;  %v1359_v12 = vld [vmem:[%s1792_s2 + $0x138] sm:$0xff]   ;;  %v1360_v13 = vld [vmem:[%s1792_s2 + $0x1e8] sm:$0xff]  }
  0x19   :  { %1183 = vmatprep.subr.bf16.mxu1 %v1322_v31  ;;  %v140_v14 = vld [vmem:[%s1790_s0 + $0x28] sm:$0xff]  ;;  %v139_v18 = vld [vmem:[%s1790_s0 + $0x20] sm:$0xff]  ;;  %v1362_v20 = vld [vmem:[%s1792_s2 + $0x1f0] sm:$0xff]  }
  0x1a   :  { %v276_v16 = vpack.c.bf16 %v140_v14, %v140_v14  ;;  %v1361_v17 = vld [vmem:[%s1792_s2 + $0x1a8] sm:$0xff]   ;;  %v275_v19 = vpack.c.bf16 %v139_v18, %v139_v18  ;;  %v1363_v21 = vld [vmem:[%s1792_s2 + $0x1b0] sm:$0xff]   ;;  %v142_v22 = vld [vmem:[%s1790_s0 + $0x38] sm:$0xff] }
  0x1b   :  { %1198 = vmatpush3.bf16.msra.mxu0 %v1317_v26  ;;  %v1364_v23 = vld [vmem:[%s1792_s2 + $0x1f8] sm:$0xff]   ;;  %v278_v24 = vpack.c.bf16 %v142_v22, %v142_v22  ;;  %v1160_v25 = vld [vmem:[%s1796_s6] ss:$0 sm:$0xff]  ;;  %v141_v27 = vld [vmem:[%s1790_s0 + $0x30] sm:$0xff] }
  0x1c   :  { %1199 = vmatprep.subr.bf16.mxu0 %v1320_v29  ;;  %1184 = vmatpush3.bf16.msra.mxu1 %v1323_v32  ;;  %v1365_v26 = vld [vmem:[%s1792_s2 + $0x1b8] sm:$0xff]  }
  0x1d   :  { %1185 = vmatprep.subr.bf16.mxu1 %v1326_v35  ;;  %843 = vrot.lane.b32.xlu0 %v1160_v25, %s1407_s1 }
  0x1f   :  { %1200 = vmatpush3.bf16.msra.mxu0 %v1321_v30 }
  0x20   :  { %1201 = vmatprep.subr.bf16.mxu0 %v1324_v33  ;;  %1186 = vmatpush3.bf16.msra.mxu1 %v1327_v36 }
  0x21   :  { %1215 = vmatprep.subr.bf16.mxu1 %v1330_v41 }
  0x23   :  { %1202 = vmatpush3.bf16.msra.mxu0 %v1325_v34  ;;  %703 = vmatmul.mubr.bf16.vlgmr.msra.gmra.mrb[0].mxu1 %v271_v43 }
  0x24   :  { %1203 = vmatprep.subr.bf16.mxu0 %v1328_v37  ;;  %1216 = vmatpush3.bf16.msra.mxu1 %v1331_v44 }
  0x25   :  { %1217 = vmatprep.subr.bf16.mxu1 %v1334_v47  ;;  %782 = vmatprep.mubr.bf16.mxu1 %v276_v16 }
  0x27   :  { %1204 = vmatpush3.bf16.msra.mxu0 %v1329_v38 }
  0x28   :  { %1205 = vmatprep.subr.bf16.mxu0 %v1332_v45  ;;  %1218 = vmatpush3.bf16.msra.mxu1 %v1335_v48 }
  0x29   :  { %1219 = vmatprep.subr.bf16.mxu1 %v1338_v51 }
  0x2b   :  { %1206 = vmatpush3.bf16.msra.mxu0 %v1333_v46 }
  0x2c   :  { %1207 = vmatprep.subr.bf16.mxu0 %v1336_v49  ;;  %1220 = vmatpush3.bf16.msra.mxu1 %v1339_v52 }
  0x2d   :  { %1221 = vmatprep.subr.bf16.mxu1 %v1342_v59 }
  0x2f   :  { %1208 = vmatpush3.bf16.msra.mxu0 %v1337_v50 }
  0x30   :  { %1237 = vmatprep.subr.bf16.mxu0 %v1340_v55  ;;  %1222 = vmatpush3.bf16.msra.mxu1 %v1343_v60 }
  0x31   :  { %1223 = vmatprep.subr.bf16.mxu1 %v1346_v63 }
  0x32   :  { %743 = vmatmul.mubr.bf16.vlgmr.msra.gmra.mrb[4].mxu0 %v273_v57 }
  0x33   :  { %1238 = vmatpush3.bf16.msra.mxu0 %v1341_v58  ;;  %822 = vmatprep.mubr.bf16.mxu0 %v278_v24 }
  0x34   :  { %1239 = vmatprep.subr.bf16.mxu0 %v1344_v61  ;;  %1224 = vmatpush3.bf16.msra.mxu1 %v1347_v0 }
  0x35   :  { %1225 = vmatprep.subr.bf16.mxu1 %v1350_v3 }
  0x37   :  { %1240 = vmatpush3.bf16.msra.mxu0 %v1345_v62 }
  0x38   :  { %1241 = vmatprep.subr.bf16.mxu0 %v1348_v1  ;;  %1226 = vmatpush3.bf16.msra.mxu1 %v1351_v4 }
  0x39   :  { %1227 = vmatprep.subr.bf16.mxu1 %v1354_v7 }
  0x3b   :  { %1242 = vmatpush3.bf16.msra.mxu0 %v1349_v2 }
  0x3c   :  { %1243 = vmatprep.subr.bf16.mxu0 %v1352_v5  ;;  %1228 = vmatpush3.bf16.msra.mxu1 %v1355_v8 }
  0x3d   :  { %1229 = vmatprep.subr.bf16.mxu1 %v1358_v11 }
  0x3f   :  { %1244 = vmatpush3.bf16.msra.mxu0 %v1353_v6 }
  0x40   :  { %1245 = vmatprep.subr.bf16.mxu0 %v1356_v9  ;;  %1230 = vmatpush3.bf16.msra.mxu1 %v1359_v12 }
  0x43   :  { %1246 = vmatpush3.bf16.msra.mxu0 %v1357_v10  ;;  %783 = vmatmul.mubr.bf16.vlgmr.msra.gmra.mrb[4].mxu1 %v275_v19 }
  0x44   :  { %1247 = vmatprep.subr.bf16.mxu0 %v1360_v13 }
  0x47   :  { %1248 = vmatpush3.bf16.msra.mxu0 %v1361_v17 }
  0x48   :  { %1249 = vmatprep.subr.bf16.mxu0 %v1362_v20 }
  0x4b   :  { %1250 = vmatpush3.bf16.msra.mxu0 %v1363_v21 }
  0x4c   :  { %16 = vsyncpa [#allocation3], 0  ;;  %1251 = vmatprep.subr.bf16.mxu0 %v1364_v23  ;;  %v277_v28 = vpack.c.bf16 %v141_v27, %v141_v27  ;;  %s1408_s2 = smov 32   ;;  %v1166_v35 = vld [vmem:[%s1798_s8] ss:$0 sm:$0xff]  ;;  %v1410_v8 = vmov 0.0  }
  0x4d   :  { %v1094_v41 = vld [vmem:[%s1795_s5] ss:$0 sm:$0xff]  ;;  %s1409_s5 = smov 96   ;;  %1265 = vmatprep.subr.bf16.mxu1 %v1410_v8  ;;  %vm1411_vm1 = vmmov 0   ;;  %v1367_v9 = vld [vmem:[%s1793_s3 + $0x8] sm:$0xff]   ;;  %vm897_vm2 = vcmask 261120  }
  0x4e   :  { %v1366_v7 = vld [vmem:[%s1793_s3] sm:$0xff]   ;;  %1269 = vmatprep.mubr.msk.bf16.mxu1 %vm1411_vm1, %v1410_v8  ;;  %s1412_s25 = smov 112   ;;  %s1413_s26 = smov 16   ;;  %vm1064_vm3 = vcmask 130048   ;;  %vm1066_vm4 = vcmask 392192   ;;  %vm1068_vm5 = vcmask 654336  }
  0x4f   :  { %1252 = vmatpush3.bf16.msra.mxu0 %v1365_v26  ;;  %1266 = vmatpush3.bf16.msra.mxu1 %v1366_v7  ;;  %v1161_v21 = vld [vmem:[%s1797_s7] ss:$0 sm:$0xff]  ;;  %s1414_s28 = smov [#allocation2]  }
  0x50   :  { %1267 = vmatprep.subr.bf16.mxu1 %v1410_v8  ;;  %s1077_s29 = sshll.u32 %s1414_s28, 4  ;;  %s1078_s29 = int_to_ptr.vmem [resolvable:$true] %s1077_s29 }
  0x51   :  { %s1382_s4 = scalar_lea.vmem %s1078_s29, 128  ;;  %p1387_p1 = scmp.lt.s32.totalorder %s1078_s29, %s1078_s29 }
  0x52   :  { %823 = vmatmul.mubr.bf16.vlgmr.msra.gmra.mrb[8].mxu0 %v277_v28  ;;  %p1383_p0 = scmp.ne.s32.totalorder %s1078_s29, %s1382_s4  ;;  %p1388_p2 = scmp.lt.s32.totalorder %s1382_s4, %s1382_s4 }
  0x53   :  { %1268 = vmatpush3.bf16.msra.mxu1 %v1367_v9 }
  0x54   :  { %1273 = vmatprep.subr.bf16.mxu1 %v1410_v8  ;;  %p1389_p3 = por %p1388_p2, %p1387_p1 }
  0x56   :  { %p1390_p4 = pnand %p1389_p3, %p1383_p0 }
  0x8f   :  { %v844_v29 = vpop.permute.xlu0 %843 }
  0xe5   :  { %v1726_v30 = vpop.f32.mrb[0].mxu0 }
  0xe6   :  { %v846_v31 = vadd.f32 %v844_v29, %v1726_v30  ;;  %v1729_v32 = vpop.f32.mrb[1].mxu0 }
  0xe7   :  { %v132_v33 = vpop.f32.mrb[2].mxu0 }
  0xe8   :  { %848 = vrot.lane.b32.xlu0 %v846_v31, %s1407_s1  ;;  %v133_v34 = vpop.f32.mrb[3].mxu0 }
  0xec   :  { %865 = vrot.lane.b32.xlu0 %v1520_v15, %s1408_s2 }
  0xf0   :  { %962 = vrot.lane.b32.xlu0 %v1166_v35, %s1408_s2 }
  0xf4   :  { %946 = vrot.lane.b32.xlu0 %v1729_v32, %s1408_s2 }
  0xf6   :  { %v1187_v36 = vpop.f32.mrb[0].mxu1 }
  0xf7   :  { %v1188_v37 = vpop.f32.mrb[1].mxu1 }
  0xf8   :  { %v1189_v38 = vadd.f32 %v1188_v37, %v1187_v36  ;;  %v1190_v39 = vpop.f32.mrb[2].mxu1 }
  0xf9   :  { %v1191_v40 = vpop.f32.mrb[3].mxu1  ;;  %v1368_v39 = vld [vmem:[%s1799_s9] sm:$0xff]  }
  0xfa   :  { %v705_v42 = vadd.f32 %v1189_v38, %v1094_v41  ;;  %v1369_v41 = vld [vmem:[%s1799_s9 + $0x8] sm:$0xff]  }
 0x105   :  { %v1209_v43 = vpop.f32.mrb[4].mxu0 }
 0x106   :  { %v1210_v44 = vpop.f32.mrb[5].mxu0 }
 0x107   :  { %v1211_v45 = vadd.f32 %v1210_v44, %v1209_v43  ;;  %v1212_v46 = vpop.f32.mrb[6].mxu0 }
 0x108   :  { %v1213_v47 = vpop.f32.mrb[7].mxu0 }
 0x109   :  { %v745_v48 = vadd.f32 %v1211_v45, %v705_v42 }
 0x116   :  { %v1231_v49 = vpop.f32.mrb[4].mxu1 }
 0x117   :  { %v1232_v50 = vpop.f32.mrb[5].mxu1 }
 0x118   :  { %v1233_v51 = vadd.f32 %v1232_v50, %v1231_v49  ;;  %v1234_v52 = vpop.f32.mrb[6].mxu1  ;;  %v1167_v49 = vld [vmem:[%s1800_s10] ss:$0 sm:$0xff] }
 0x119   :  { %v1235_v53 = vpop.f32.mrb[7].mxu1 }
 0x11a   :  { %v785_v54 = vadd.f32 %v1233_v51, %v745_v48 }
 0x125   :  { %v1253_v55 = vpop.f32.mrb[8].mxu0 }
 0x126   :  { %v1254_v56 = vpop.f32.mrb[9].mxu0 }
 0x127   :  { %v1255_v57 = vadd.f32 %v1254_v56, %v1253_v55  ;;  %v1256_v58 = vpop.f32.mrb[10].mxu0 }
 0x128   :  { %v1257_v59 = vpop.f32.mrb[11].mxu0 }
 0x129   :  { %v825_v60 = vadd.f32 %v1255_v57, %v785_v54 }
 0x12b   :  { %v831_v61 = vadd.f32 %v825_v60, %v1726_v30 }
 0x12d   :  { %v1159_v62 = vmul.f32 -1.442695, %v831_v61 }
 0x12f   :  { %1370 = vpow2.f32 %v1159_v62 }
 0x139   :  { %v1371_v63 = vpop.eup %1370 }
 0x13a   :  { %v835_v0 = vadd.f32 1.0, %v1371_v63 }
 0x13c   :  { %1372 = vrcp.f32 %v835_v0 }
 0x146   :  { %v1373_v1 = vpop.eup %1372 }
 0x147   :  { %v858_v11 = vsub.f32 1.0, %v1373_v1 }
 0x15a   :  { %v849_v2 = vpop.permute.xlu0 %848 }
 0x15b   :  { %v851_v3 = vmul.f32 %v1373_v1, %v849_v2 }
 0x15d   :  { %853 = vrot.lane.b32.xlu1 %v851_v3, %s1407_s1 }
 0x15e   :  { %v866_v10 = vpop.permute.xlu0 %865 }
 0x15f   :  { %v868_v13 = vmul.f32 %v1373_v1, %v866_v10 }
 0x162   :  { %v963_v18 = vpop.permute.xlu0 %962 }
 0x163   :  { %v965_v19 = vadd.f32 %v963_v18, %v1729_v32 }
 0x166   :  { %v947_v24 = vpop.permute.xlu0 %946 }
 0x1cf   :  { %v854_v4 = vpop.permute.xlu1 %853 }
 0x1d0   :  { %v856_v5 = vadd.f32 %v854_v4, %v825_v60 }
 0x1d2   :  { %1374 = vtanh.f32 %v856_v5 }
 0x1dc   :  { %v1375_v6 = vpop.eup %1374 }
 0x1dd   :  { %860 = vrot.lane.b32.xlu1 %v1375_v6, %s1409_s5 }
 0x24f   :  { %v861_v12 = vpop.permute.xlu1 %860 }
 0x250   :  { %v863_v14 = vmul.f32 %v861_v12, %v858_v11 }
 0x252   :  { %v869_v16 = vadd.f32 %v868_v13, %v863_v14 }
 0x254   :  { %v874_v17 = vpack.c.bf16 %v869_v16, %v869_v16 }
 0x256   :  { %883 = vrot.lane.b32.xlu1 %v874_v17, %s1409_s5 }
 0x25a   :  { %944 = vrot.lane.b32.xlu1 %v1726_v30, %s1408_s2 }
 0x25e   :  { %967 = vrot.lane.b32.xlu1 %v965_v19, %s1409_s5 }
 0x2c8   :  { %v884_v20 = vpop.permute.xlu1 %883 }
 0x2c9   :  { %1270 = vmatmul.mubr.msk.bf16.vlgmr.msra.gmra.mrb[8].mxu1 %vm897_vm2, %v884_v20 }
 0x2ca   :  { %1277 = vmatprep.mubr.msk.bf16.mxu1 %vm1411_vm1, %v1410_v8  ;;  %1274 = vmatpush3.bf16.msra.mxu1 %v1368_v39 }
 0x2cb   :  { %1275 = vmatprep.subr.bf16.mxu1 %v1410_v8 }
 0x2cc   :  { %v945_v22 = vpop.permute.xlu1 %944 }
 0x2cd   :  { %v948_v27 = vsel %vm897_vm2, %v945_v22, %v947_v24 }
 0x2ce   :  { %1276 = vmatpush3.bf16.msra.mxu1 %v1369_v41 }
 0x2d0   :  { %v968_v35 = vpop.permute.xlu1 %967 }
 0x39c   :  { %v935_v23 = vpop.f32.mrb[8].mxu1 }
 0x39d   :  { %v936_v25 = vadd.f32 %v1161_v21, %v935_v23  ;;  %v1271_v26 = vpop.f32.mrb[9].mxu1 }
 0x39e   :  { %v938_v28 = vpop.f32.mrb[10].mxu1 }
 0x39f   :  { %v950_v29 = vadd.f32 %v948_v27, %v936_v25  ;;  %v1272_v30 = vpop.f32.mrb[11].mxu1 }
 0x3a1   :  { %v1165_v31 = vmul.f32 -1.442695, %v950_v29 }
 0x3a3   :  { %1376 = vpow2.f32 %v1165_v31 }
 0x3ad   :  { %v1377_v32 = vpop.eup %1376 }
 0x3ae   :  { %v954_v33 = vadd.f32 1.0, %v1377_v32 }
 0x3b0   :  { %1378 = vrcp.f32 %v954_v33 }
 0x3ba   :  { %v1379_v34 = vpop.eup %1378 }
 0x3bb   :  { %v970_v36 = vmul.f32 %v1379_v34, %v968_v35  ;;  %v977_v42 = vsub.f32 1.0, %v1379_v34  ;;  %v983_v44 = vmul.f32 %v1379_v34, %v1520_v15 }
 0x3bd   :  { %972 = vrot.lane.b32.xlu0 %v970_v36, %s1407_s1 }
 0x42f   :  { %v973_v37 = vpop.permute.xlu0 %972 }
 0x430   :  { %v975_v38 = vadd.f32 %v973_v37, %v936_v25 }
 0x432   :  { %1380 = vtanh.f32 %v975_v38 }
 0x43c   :  { %v1381_v40 = vpop.eup %1380 }
 0x43d   :  { %979 = vrot.lane.b32.xlu1 %v1381_v40, %s1409_s5 }
 0x441   :  { %1057 = vrot.lane.b32.xlu1 %v869_v16, %s1412_s25 }
 0x4af   :  { %v980_v43 = vpop.permute.xlu1 %979 }
 0x4b0   :  { %v982_v45 = vmul.f32 %v980_v43, %v977_v42 }
 0x4b2   :  { %v984_v46 = vadd.f32 %v983_v44, %v982_v45 }
 0x4b3   :  { %v1058_v55 = vpop.permute.xlu1 %1057 }
 0x4b4   :  { %v989_v47 = vpack.c.bf16 %v984_v46, %v984_v46 }
 0x4b6   :  { %998 = vrot.lane.b32.xlu0 %v989_v47, %s1409_s5 }
 0x4ba   :  { %1061 = vrot.lane.b32.xlu0 %v984_v46, %s1413_s26 }
 0x528   :  { %v999_v48 = vpop.permute.xlu0 %998 }
 0x529   :  { %1278 = vmatmul.mubr.msk.bf16.vlgmr.msra.gmra.mrb[12].mxu1 %vm897_vm2, %v999_v48 }
 0x52c   :  { %v1062_v56 = vpop.permute.xlu0 %1061 }
 0x5fc   :  { %v1049_v50 = vpop.f32.mrb[12].mxu1 }
 0x5fd   :  { %v1050_v51 = vadd.f32 %v1167_v49, %v1049_v50  ;;  %v1279_v52 = vpop.f32.mrb[13].mxu1 }
 0x5fe   :  { %v1052_v53 = vpop.f32.mrb[14].mxu1 }
 0x5ff   :  { %v1055_v15 = vmax.f32 %v1050_v51, 0.0  ;;  %v1280_v54 = vpop.f32.mrb[15].mxu1 }
 0x601   :  { %v1065_v57 = vsel %vm1064_vm3, %v1055_v15, %v1058_v55 }
 0x602   :  { %v1067_v58 = vsel %vm1066_vm4, %v1065_v57, %v1062_v56 }
 0x603   :  { %v1069_v59 = vsel %vm1068_vm5, %v1067_v58, 0.0 }
 0x604   :  { %1070 = vst [vmem:[#allocation2] sm:$0xff] %v1069_v59 }
 0x605   :  { %1393 = shalt.err (!%p1390_p4)
}
 0x606   :  { %s1394_s12 = scalar_lea.hbm %s1801_s11, 128 }
 0x607   :  { %p1395_p5 = scmp.ne.s32.totalorder %s1801_s11, %s1394_s12  ;;  %p1398_p6 = scmp.lt.u32.totalorder %s1394_s12, %s1801_s11 }
 0x609   :  { %p1400_p7 = pnand %p1398_p6, %p1395_p5 }
 0x60b   :  { %1403 = shalt.err (!%p1400_p7)
}
 0x60c   :  { %1080 = dma.vmem_to_hbm [thread:$0]  %s1078_s29, 128, %s1801_s11, [#allocation3]  }
 0x60d   :  { %1404 = dma.done.wait [#allocation3], 128  }
 0x60e   :  { %1405 = vsyncadd [#allocation3], 4294967168 }
 0x60f   :  { %1084 = vsyncpa [#allocation3], 1 }

</bundles_post_ra>
